<compile_context>
chip_gen: v7x
topology: tpu7x:2x2x1
jax: 0.10.0
libtpu: 0.0.40
codegen_flags: <defaults>
</compile_context>

<pallas_src>
import functools
import math

import jax
import jax.numpy as jnp
from jax.experimental import pallas as pl
from jax.experimental.pallas import tpu as pltpu


def _round_up(x: int, m: int) -> int:
    return ((x + m - 1) // m) * m


def _matmul_bias_act_kernel(lhs_ref, rhs_ref, bias_ref, out_ref, acc_ref, *,
                            apply_gelu):
    k = pl.program_id(2)

    @pl.when(k == 0)
    def _():
        acc_ref[...] = jnp.zeros_like(acc_ref)

    # bf16 x bf16 -> f32 on the MXU
    acc_ref[...] += jnp.dot(lhs_ref[...], rhs_ref[...],
                            preferred_element_type=jnp.float32)

    @pl.when(k == pl.num_programs(2) - 1)
    def _():
        acc = acc_ref[...] + bias_ref[...]
        if apply_gelu:
            # exact GELU == nn.GELU() default (approximate='none')
            acc = 0.5 * acc * (1.0 + jax.lax.erf(acc * (1.0 / math.sqrt(2.0))))
        out_ref[...] = acc.astype(out_ref.dtype)


def _pallas_matmul_bias_act(lhs, rhs, bias, apply_gelu, out_dtype):
    """Tiled (M,K)x(K,N) matmul + bias (+ GELU). lhs/rhs bf16, bias f32."""
    M, K = lhs.shape
    K2, N = rhs.shape
    assert K == K2

    # --- tile / pad sizing (fits comfortably in v5e/v6e/v7x scoped VMEM) ----
    tm = min(512, _round_up(M, 8))
    Mp = _round_up(M, tm)

    Np = _round_up(N, 128)                    # lane-dense output stores
    tn = 256 if Np % 256 == 0 else 128

    Kp = _round_up(K, 128)                    # full-width MXU contraction
    tk = next(c for c in (512, 256, 128) if Kp % c == 0)

    lhs_p = lhs if (Mp == M and Kp == K) else jnp.pad(
        lhs, ((0, Mp - M), (0, Kp - K)))
    rhs_p = rhs if (Kp == K and Np == N) else jnp.pad(
        rhs, ((0, Kp - K), (0, Np - N)))
    bias_p = bias if Np == N else jnp.pad(bias, ((0, 0), (0, Np - N)))

    grid = (Mp // tm, Np // tn, Kp // tk)
    kernel = functools.partial(_matmul_bias_act_kernel, apply_gelu=apply_gelu)

    out = pl.pallas_call(
        kernel,
        out_shape=jax.ShapeDtypeStruct((Mp, Np), out_dtype),
        grid=grid,
        in_specs=[
            pl.BlockSpec((tm, tk), lambda i, j, k: (i, k)),
            pl.BlockSpec((tk, tn), lambda i, j, k: (k, j)),
            pl.BlockSpec((1, tn), lambda i, j, k: (0, j)),
        ],
        out_specs=pl.BlockSpec((tm, tn), lambda i, j, k: (i, j)),
        scratch_shapes=[pltpu.VMEM((tm, tn), jnp.float32)],
        compiler_params=pltpu.CompilerParams(
            dimension_semantics=("parallel", "parallel", "arbitrary"),
            vmem_limit_bytes=32 * 1024 * 1024,
        ),
    )(lhs_p, rhs_p, bias_p)

    if Mp != M or Np != N:
        out = out[:M, :N]
    return out


def conv3x3_s2p1(x_nhwc, w, b, apply_gelu, out_dtype):
    """3x3 conv, stride 2, padding 1 on NHWC input.

    x_nhwc: (B, H, W, Cin); w: (3, 3, Cin, Cout); b: (Cout,)
    Returns (B, H//2, W//2, Cout) in `out_dtype`.
    """
    B, H, W, Cin = x_nhwc.shape
    Cout = w.shape[-1]
    Ho, Wo = (H + 2 - 3) // 2 + 1, (W + 2 - 3) // 2 + 1

    # im2col in bf16 (layout glue; matmul+bias+GELU run inside the kernel).
    # TODO(synk): fold the 9-tap gather into the kernel (manual DMA from a
    # pl.ANY HBM ref) to avoid materializing the 9x im2col buffer in HBM.
    x16 = x_nhwc.astype(jnp.bfloat16)
    xp = jnp.pad(x16, ((0, 0), (1, 1), (1, 1), (0, 0)))
    cols = [xp[:, kh:kh + 2 * Ho:2, kw:kw + 2 * Wo:2, :]
            for kh in range(3) for kw in range(3)]
    patches = jnp.stack(cols, axis=3)               # (B, Ho, Wo, 9, Cin)
    lhs = patches.reshape(B * Ho * Wo, 9 * Cin)     # (M, K) bf16
    rhs = w.reshape(9 * Cin, Cout).astype(jnp.bfloat16)   # (kh,kw,cin) order
    bias = b.reshape(1, Cout).astype(jnp.float32)

    out = _pallas_matmul_bias_act(lhs, rhs, bias, apply_gelu, out_dtype)
    return out.reshape(B, Ho, Wo, Cout)


class PatchProjection:
    """JAX/Pallas port of comvex.xcit.PatchProjection."""

    def __init__(self, image_channel: int, patch_size: int, dim: int, key) -> None:
        assert math.log2(patch_size) == int(math.log2(patch_size)), \
            f"`patch_size`: {patch_size} must be a power of 2"
        base_dimension_scale = 1 / (patch_size // 2)
        num_layers = int(math.log2(patch_size))
        self.layers = []
        for idx in range(num_layers * 2 - 1):
            if idx % 2 == 0:
                cin = (int(dim * base_dimension_scale * 2 ** (idx // 2 - 1))
                       if idx != 0 else image_channel)
                cout = int(dim * base_dimension_scale * 2 ** (idx // 2))
                key, k_w, k_b = jax.random.split(key, 3)
                # PyTorch default Conv2d init: U(-1/sqrt(fan_in), 1/sqrt(fan_in))
                fan_in = cin * 3 * 3
                bound = 1.0 / math.sqrt(fan_in)
                w = jax.random.uniform(k_w, (3, 3, cin, cout), jnp.float32,
                                       minval=-bound, maxval=bound)
                b = jax.random.uniform(k_b, (cout,), jnp.float32,
                                       minval=-bound, maxval=bound)
                self.layers.append(("conv", w, b))
            else:
                self.layers.append(("gelu",))
        self._jit_forward = jax.jit(self._forward)

    def _forward(self, x_nchw):
        # NCHW (PyTorch) -> NHWC (kernel layout)
        x = jnp.transpose(x_nchw, (0, 2, 3, 1))
        i = 0
        while i < len(self.layers):
            tag = self.layers[i][0]
            assert tag == "conv"
            _, w, b = self.layers[i]
            fuse_gelu = (i + 1 < len(self.layers)
                         and self.layers[i + 1][0] == "gelu")
            # intermediate activations stay bf16 (halves HBM bytes for the
            # next im2col); final conv output is f32.
            out_dtype = jnp.bfloat16 if fuse_gelu else jnp.float32
            x = conv3x3_s2p1(x, w, b, fuse_gelu, out_dtype)
            i += 2 if fuse_gelu else 1
        # back to NCHW to match the PyTorch forward's output convention
        return jnp.transpose(x, (0, 3, 1, 2))

    def __call__(self, x_nchw):
        return self._jit_forward(x_nchw)


if __name__ == "__main__":
    key = jax.random.PRNGKey(0)
    k_x, k_params = jax.random.split(key)

    # small shapes consistent with the module: patch_size=4 -> 2 convs
    batch, image_channel, spatial = 2, 4, 16
    patch_size, dim = 4, 32

    x = jax.random.normal(k_x, (batch, image_channel, spatial, spatial),
                          dtype=jnp.float32)

    module = PatchProjection(image_channel, patch_size, dim, k_params)
    out = module(x)
    out = jax.block_until_ready(out)

    expected_shape = (batch, dim, spatial // patch_size, spatial // patch_size)
    assert out.shape == expected_shape, (out.shape, expected_shape)
    assert jnp.all(jnp.isfinite(out))
    print("KERNEL_OK")
</pallas_src>

<mosaic_0001>
module attributes {stable_mosaic.version = 11 : i64} {
  func.func @_matmul_bias_act_kernel(%arg0: i32, %arg1: i32, %arg2: i32, %arg3: memref<128x128xbf16, #tpu.memory_space<vmem>>, %arg4: memref<128x128xbf16, #tpu.memory_space<vmem>>, %arg5: memref<1x128xf32, #tpu.memory_space<vmem>>, %arg6: memref<128x128xbf16, #tpu.memory_space<vmem>>, %arg7: memref<128x128xf32, #tpu.memory_space<vmem>>) attributes {dimension_semantics = [#tpu.dimension_semantics<parallel>, #tpu.dimension_semantics<parallel>, #tpu.dimension_semantics<arbitrary>], iteration_bounds = array<i64: 1, 1, 1>, scalar_prefetch = 0 : i64, scratch_operands = 1 : i64, tpu.core_type = #tpu.core_type<tc>, window_params = [{transform_indices = @transform_0, window_bounds = array<i64: 128, 128>}, {transform_indices = @transform_1, window_bounds = array<i64: 128, 128>}, {transform_indices = @transform_2, window_bounds = array<i64: 1, 128>}, {transform_indices = @transform_3, window_bounds = array<i64: 128, 128>}]} {
    %c0_i32 = arith.constant 0 : i32
    %0 = arith.cmpi eq, %arg2, %c0_i32 : i32
    %1 = arith.extui %0 : i1 to i32
    %c0_i32_0 = arith.constant 0 : i32
    %2 = arith.cmpi ne, %1, %c0_i32_0 : i32
    scf.if %2 {
      %cst_10 = arith.constant 0.000000e+00 : f32
      %12 = vector.broadcast %cst_10 : f32 to vector<128x128xf32>
      %c0_11 = arith.constant 0 : index
      %c0_12 = arith.constant 0 : index
      %13 = vector.load %arg7[%c0_11, %c0_12] : memref<128x128xf32, #tpu.memory_space<vmem>>, vector<128x128xf32>
      tpu.vector_store %arg7[%c0_11, %c0_12], %12 {strides = array<i32>} : memref<128x128xf32, #tpu.memory_space<vmem>>, vector<128x128xf32>,
    } else {
    }
    %c0 = arith.constant 0 : index
    %c0_1 = arith.constant 0 : index
    %3 = vector.load %arg7[%c0, %c0_1] : memref<128x128xf32, #tpu.memory_space<vmem>>, vector<128x128xf32>
    %c0_2 = arith.constant 0 : index
    %c0_3 = arith.constant 0 : index
    %4 = vector.load %arg3[%c0_2, %c0_3] : memref<128x128xbf16, #tpu.memory_space<vmem>>, vector<128x128xbf16>
    %c0_4 = arith.constant 0 : index
    %c0_5 = arith.constant 0 : index
    %5 = vector.load %arg4[%c0_4, %c0_5] : memref<128x128xbf16, #tpu.memory_space<vmem>>, vector<128x128xbf16>
    %cst = arith.constant dense<0.000000e+00> : vector<128x128xf32>
    %6 = tpu.matmul %4, %5, %cst {dimension_numbers = #tpu.dot_dimension_numbers<[1], [0], [0], [1], [0, 0, 1, 1], [], []>} : vector<128x128xbf16>, vector<128x128xbf16>, vector<128x128xf32> -> vector<128x128xf32>
    %7 = arith.addf %3, %6 : vector<128x128xf32>
    %c0_6 = arith.constant 0 : index
    %c0_7 = arith.constant 0 : index
    %8 = vector.load %arg7[%c0_6, %c0_7] : memref<128x128xf32, #tpu.memory_space<vmem>>, vector<128x128xf32>
    tpu.vector_store %arg7[%c0_6, %c0_7], %7 {strides = array<i32>} : memref<128x128xf32, #tpu.memory_space<vmem>>, vector<128x128xf32>,
    %c0_i32_8 = arith.constant 0 : i32
    %9 = arith.cmpi eq, %arg2, %c0_i32_8 : i32
    %10 = arith.extui %9 : i1 to i32
    %c0_i32_9 = arith.constant 0 : i32
    %11 = arith.cmpi ne, %10, %c0_i32_9 : i32
    scf.if %11 {
      %c0_10 = arith.constant 0 : index
      %c0_11 = arith.constant 0 : index
      %12 = vector.load %arg7[%c0_10, %c0_11] : memref<128x128xf32, #tpu.memory_space<vmem>>, vector<128x128xf32>
      %c0_12 = arith.constant 0 : index
      %c0_13 = arith.constant 0 : index
      %13 = vector.load %arg5[%c0_12, %c0_13] : memref<1x128xf32, #tpu.memory_space<vmem>>, vector<1x128xf32>
      %14 = vector.broadcast %13 : vector<1x128xf32> to vector<128x128xf32>
      %15 = arith.addf %12, %14 : vector<128x128xf32>
      %cst_14 = arith.constant 5.000000e-01 : f32
      %16 = vector.broadcast %cst_14 : f32 to vector<128x128xf32>
      %17 = arith.mulf %16, %15 : vector<128x128xf32>
      %cst_15 = arith.constant 0.707106769 : f32
      %18 = vector.broadcast %cst_15 : f32 to vector<128x128xf32>
      %19 = arith.mulf %15, %18 : vector<128x128xf32>
      %20 = math.erf %19 : vector<128x128xf32>
      %cst_16 = arith.constant 1.000000e+00 : f32
      %21 = vector.broadcast %cst_16 : f32 to vector<128x128xf32>
      %22 = arith.addf %21, %20 : vector<128x128xf32>
      %23 = arith.mulf %17, %22 : vector<128x128xf32>
      %24 = arith.truncf %23 : vector<128x128xf32> to vector<128x128xbf16>
      %c0_17 = arith.constant 0 : index
      %c0_18 = arith.constant 0 : index
      %25 = vector.load %arg6[%c0_17, %c0_18] : memref<128x128xbf16, #tpu.memory_space<vmem>>, vector<128x128xbf16>
      tpu.vector_store %arg6[%c0_17, %c0_18], %24 {strides = array<i32>} : memref<128x128xbf16, #tpu.memory_space<vmem>>, vector<128x128xbf16>,
    } else {
    }
    return
  }
  func.func @transform_0(%arg0: i32, %arg1: i32, %arg2: i32) -> (i32, i32) {
    %c0_i32 = arith.constant 0 : i32
    return %arg0, %arg2 : i32, i32
  }
  func.func @transform_1(%arg0: i32, %arg1: i32, %arg2: i32) -> (i32, i32) {
    %c0_i32 = arith.constant 0 : i32
    return %arg2, %arg1 : i32, i32
  }
  func.func @transform_2(%arg0: i32, %arg1: i32, %arg2: i32) -> (i32, i32) {
    %c0_i32 = arith.constant 0 : i32
    %c0_i32_0 = arith.constant 0 : i32
    return %c0_i32, %arg1 : i32, i32
  }
  func.func @transform_3(%arg0: i32, %arg1: i32, %arg2: i32) -> (i32, i32) {
    %c0_i32 = arith.constant 0 : i32
    return %arg0, %arg1 : i32, i32
  }
}

module attributes {stable_mosaic.version = 11 : i64} {
  func.func @_matmul_bias_act_kernel(%arg0: i32, %arg1: i32, %arg2: i32, %arg3: memref<32x256xbf16, #tpu.memory_space<vmem>>, %arg4: memref<256x128xbf16, #tpu.memory_space<vmem>>, %arg5: memref<1x128xf32, #tpu.memory_space<vmem>>, %arg6: memref<32x128xf32, #tpu.memory_space<vmem>>, %arg7: memref<32x128xf32, #tpu.memory_space<vmem>>) attributes {dimension_semantics = [#tpu.dimension_semantics<parallel>, #tpu.dimension_semantics<parallel>, #tpu.dimension_semantics<arbitrary>], iteration_bounds = array<i64: 1, 1, 1>, scalar_prefetch = 0 : i64, scratch_operands = 1 : i64, tpu.core_type = #tpu.core_type<tc>, window_params = [{transform_indices = @transform_0, window_bounds = array<i64: 32, 256>}, {transform_indices = @transform_1, window_bounds = array<i64: 256, 128>}, {transform_indices = @transform_2, window_bounds = array<i64: 1, 128>}, {transform_indices = @transform_3, window_bounds = array<i64: 32, 128>}]} {
    %c0_i32 = arith.constant 0 : i32
    %0 = arith.cmpi eq, %arg2, %c0_i32 : i32
    %1 = arith.extui %0 : i1 to i32
    %c0_i32_0 = arith.constant 0 : i32
    %2 = arith.cmpi ne, %1, %c0_i32_0 : i32
    scf.if %2 {
      %cst_10 = arith.constant 0.000000e+00 : f32
      %12 = vector.broadcast %cst_10 : f32 to vector<32x128xf32>
      %c0_11 = arith.constant 0 : index
      %c0_12 = arith.constant 0 : index
      %13 = vector.load %arg7[%c0_11, %c0_12] : memref<32x128xf32, #tpu.memory_space<vmem>>, vector<32x128xf32>
      tpu.vector_store %arg7[%c0_11, %c0_12], %12 {strides = array<i32>} : memref<32x128xf32, #tpu.memory_space<vmem>>, vector<32x128xf32>,
    } else {
    }
    %c0 = arith.constant 0 : index
    %c0_1 = arith.constant 0 : index
    %3 = vector.load %arg7[%c0, %c0_1] : memref<32x128xf32, #tpu.memory_space<vmem>>, vector<32x128xf32>
    %c0_2 = arith.constant 0 : index
    %c0_3 = arith.constant 0 : index
    %4 = vector.load %arg3[%c0_2, %c0_3] : memref<32x256xbf16, #tpu.memory_space<vmem>>, vector<32x256xbf16>
    %c0_4 = arith.constant 0 : index
    %c0_5 = arith.constant 0 : index
    %5 = vector.load %arg4[%c0_4, %c0_5] : memref<256x128xbf16, #tpu.memory_space<vmem>>, vector<256x128xbf16>
    %cst = arith.constant dense<0.000000e+00> : vector<32x128xf32>
    %6 = tpu.matmul %4, %5, %cst {dimension_numbers = #tpu.dot_dimension_numbers<[1], [0], [0], [1], [0, 0, 1, 1], [], []>} : vector<32x256xbf16>, vector<256x128xbf16>, vector<32x128xf32> -> vector<32x128xf32>
    %7 = arith.addf %3, %6 : vector<32x128xf32>
    %c0_6 = arith.constant 0 : index
    %c0_7 = arith.constant 0 : index
    %8 = vector.load %arg7[%c0_6, %c0_7] : memref<32x128xf32, #tpu.memory_space<vmem>>, vector<32x128xf32>
    tpu.vector_store %arg7[%c0_6, %c0_7], %7 {strides = array<i32>} : memref<32x128xf32, #tpu.memory_space<vmem>>, vector<32x128xf32>,
    %c0_i32_8 = arith.constant 0 : i32
    %9 = arith.cmpi eq, %arg2, %c0_i32_8 : i32
    %10 = arith.extui %9 : i1 to i32
    %c0_i32_9 = arith.constant 0 : i32
    %11 = arith.cmpi ne, %10, %c0_i32_9 : i32
    scf.if %11 {
      %c0_10 = arith.constant 0 : index
      %c0_11 = arith.constant 0 : index
      %12 = vector.load %arg7[%c0_10, %c0_11] : memref<32x128xf32, #tpu.memory_space<vmem>>, vector<32x128xf32>
      %c0_12 = arith.constant 0 : index
      %c0_13 = arith.constant 0 : index
      %13 = vector.load %arg5[%c0_12, %c0_13] : memref<1x128xf32, #tpu.memory_space<vmem>>, vector<1x128xf32>
      %14 = vector.broadcast %13 : vector<1x128xf32> to vector<32x128xf32>
      %15 = arith.addf %12, %14 : vector<32x128xf32>
      %c0_14 = arith.constant 0 : index
      %c0_15 = arith.constant 0 : index
      %16 = vector.load %arg6[%c0_14, %c0_15] : memref<32x128xf32, #tpu.memory_space<vmem>>, vector<32x128xf32>
      tpu.vector_store %arg6[%c0_14, %c0_15], %15 {strides = array<i32>} : memref<32x128xf32, #tpu.memory_space<vmem>>, vector<32x128xf32>,
    } else {
    }
    return
  }
  func.func @transform_0(%arg0: i32, %arg1: i32, %arg2: i32) -> (i32, i32) {
    %c0_i32 = arith.constant 0 : i32
    return %arg0, %arg2 : i32, i32
  }
  func.func @transform_1(%arg0: i32, %arg1: i32, %arg2: i32) -> (i32, i32) {
    %c0_i32 = arith.constant 0 : i32
    return %arg2, %arg1 : i32, i32
  }
  func.func @transform_2(%arg0: i32, %arg1: i32, %arg2: i32) -> (i32, i32) {
    %c0_i32 = arith.constant 0 : i32
    %c0_i32_0 = arith.constant 0 : i32
    return %c0_i32, %arg1 : i32, i32
  }
  func.func @transform_3(%arg0: i32, %arg1: i32, %arg2: i32) -> (i32, i32) {
    %c0_i32 = arith.constant 0 : i32
    return %arg0, %arg1 : i32, i32
  }
}

</mosaic_0001>

<bundles_post_ra>
// kernel: _forward.2
= control target key start
LH: loop header
LB: loop body
LE: loop exit
PB: predicated region body
PF: predicated region fallthrough
CT: control target
= control target key end

     0   :  { %s857_s1 = inlined_call_operand.vmem [shape: bf16[128,128], index: 1, kind: input, shape index: {}]   ;;  %s858_s0 = inlined_call_operand.vmem [shape: bf16[128,128], index: 0, kind: input, shape index: {}]   ;;  %s859_s2 = inlined_call_operand.vmem [shape: f32[1,128], index: 2, kind: input, shape index: {}]   ;;  %s860_s3 = inlined_call_operand.vmem [shape: bf16[128,128], index: 3, kind: output, shape index: {}]  }
   0x1   :  { %v674_v0 = vld [vmem:[%s857_s1] sm:$0xff]   ;;  %v675_v1 = vld [vmem:[%s857_s1 + $0x8] sm:$0xff]   ;;  %v676_v2 = vld [vmem:[%s857_s1 + $0x10] sm:$0xff]  }
   0x2   :  { %626 = vmatprep.subr.bf16.mxu0 %v674_v0  ;;  %658 = vmatprep.subr.bf16.mxu1 %v674_v0  ;;  %v677_v3 = vld [vmem:[%s857_s1 + $0x18] sm:$0xff]   ;;  %v682_v4 = vld [vmem:[%s858_s0] sm:$0xff]   ;;  %v679_v7 = vld [vmem:[%s857_s1 + $0x28] sm:$0xff]  }
   0x3   :  { %627 = vmatpush3.bf16.msra.mxu0 %v674_v0  ;;  %666 = vmatpush3.bf16.msra.mxu1 %v674_v0  ;;  %v683_v5 = vld [vmem:[%s858_s0 + $0x20] sm:$0xff]   ;;  %v680_v8 = vld [vmem:[%s857_s1 + $0x30] sm:$0xff]   ;;  %v681_v9 = vld [vmem:[%s857_s1 + $0x38] sm:$0xff]  }
   0x4   :  { %628 = vmatprep.subr.bf16.mxu0 %v675_v1  ;;  %659 = vmatprep.subr.bf16.mxu1 %v675_v1  ;;  %v678_v6 = vld [vmem:[%s857_s1 + $0x20] sm:$0xff]   ;;  %v684_v10 = vld [vmem:[%s858_s0 + $0x8] sm:$0xff]   ;;  %v686_v12 = vld [vmem:[%s858_s0 + $0x10] sm:$0xff]  }
   0x5   :  { %642 = vmatprep.mubr.bf16.mxu0 %v682_v4  ;;  %650 = vmatprep.mubr.bf16.mxu1 %v683_v5  ;;  %v685_v11 = vld [vmem:[%s858_s0 + $0x28] sm:$0xff]   ;;  %v687_v13 = vld [vmem:[%s858_s0 + $0x30] sm:$0xff]   ;;  %v688_v14 = vld [vmem:[%s858_s0 + $0x18] sm:$0xff]  }
   0x6   :  { %v689_v15 = vld [vmem:[%s858_s0 + $0x38] sm:$0xff]   ;;  %v530_v16 = vld [vmem:[%s859_s2] ss:$0 sm:$0xff] }
   0x7   :  { %629 = vmatpush3.bf16.msra.mxu0 %v675_v1  ;;  %667 = vmatpush3.bf16.msra.mxu1 %v675_v1 }
   0x8   :  { %630 = vmatprep.subr.bf16.mxu0 %v676_v2  ;;  %660 = vmatprep.subr.bf16.mxu1 %v676_v2 }
   0xb   :  { %631 = vmatpush3.bf16.msra.mxu0 %v676_v2  ;;  %668 = vmatpush3.bf16.msra.mxu1 %v676_v2 }
   0xc   :  { %632 = vmatprep.subr.bf16.mxu0 %v677_v3  ;;  %661 = vmatprep.subr.bf16.mxu1 %v677_v3 }
   0xf   :  { %633 = vmatpush3.bf16.msra.mxu0 %v677_v3  ;;  %669 = vmatpush3.bf16.msra.mxu1 %v677_v3 }
  0x10   :  { %634 = vmatprep.subr.bf16.mxu0 %v678_v6  ;;  %662 = vmatprep.subr.bf16.mxu1 %v678_v6 }
  0x13   :  { %635 = vmatpush3.bf16.msra.mxu0 %v678_v6  ;;  %670 = vmatpush3.bf16.msra.mxu1 %v678_v6 }
  0x14   :  { %636 = vmatprep.subr.bf16.mxu0 %v679_v7  ;;  %663 = vmatprep.subr.bf16.mxu1 %v679_v7 }
  0x17   :  { %637 = vmatpush3.bf16.msra.mxu0 %v679_v7  ;;  %671 = vmatpush3.bf16.msra.mxu1 %v679_v7 }
  0x18   :  { %638 = vmatprep.subr.bf16.mxu0 %v680_v8  ;;  %664 = vmatprep.subr.bf16.mxu1 %v680_v8 }
  0x1b   :  { %639 = vmatpush3.bf16.msra.mxu0 %v680_v8  ;;  %672 = vmatpush3.bf16.msra.mxu1 %v680_v8 }
  0x1c   :  { %640 = vmatprep.subr.bf16.mxu0 %v681_v9  ;;  %665 = vmatprep.subr.bf16.mxu1 %v681_v9 }
  0x1f   :  { %641 = vmatpush3.bf16.msra.mxu0 %v681_v9  ;;  %673 = vmatpush3.bf16.msra.mxu1 %v681_v9 }
  0x22   :  { %643 = vmatmul.mubr.bf16.vlgmr.msra.gmra.mrb[0].mxu0 %v684_v10  ;;  %651 = vmatmul.mubr.bf16.vlgmr.msra.gmra.mrb[0].mxu1 %v685_v11 }
  0x23   :  { %646 = vmatprep.mubr.bf16.mxu0 %v686_v12  ;;  %654 = vmatprep.mubr.bf16.mxu1 %v687_v13 }
  0x2a   :  { %647 = vmatmul.mubr.bf16.gmra.mrb[4].mxu0 %v688_v14  ;;  %655 = vmatmul.mubr.bf16.gmra.mrb[4].mxu1 %v689_v15 }
  0xf5   :  { %v644_v17 = vpop.f32.mrb[0].mxu0  ;;  %v652_v18 = vpop.f32.mrb[0].mxu1 }
  0xf6   :  { %v336_v19 = vadd.f32 %v644_v17, %v530_v16  ;;  %v344_v20 = vadd.f32 %v652_v18, %v530_v16  ;;  %v213_v21 = vpop.f32.mrb[1].mxu0  ;;  %v245_v22 = vpop.f32.mrb[1].mxu1 }
  0xf7   :  { %v334_v23 = vadd.f32 %v530_v16, %v213_v21  ;;  %v342_v24 = vadd.f32 %v530_v16, %v245_v22  ;;  %v645_v25 = vpop.f32.mrb[2].mxu0  ;;  %v653_v26 = vpop.f32.mrb[2].mxu1 }
  0xf8   :  { %v368_v27 = vmul.f32 0.70710677, %v336_v19  ;;  %v376_v28 = vmul.f32 0.70710677, %v344_v20  ;;  %v337_v31 = vadd.f32 %v645_v25, %v530_v16  ;;  %v793_v32 = vadd.f32 %v653_v26, %v530_v16  ;;  %v216_v33 = vpop.f32.mrb[3].mxu0  ;;  %v248_v34 = vpop.f32.mrb[3].mxu1 }
  0xf9   :  { %v366_v29 = vmul.f32 0.70710677, %v334_v23  ;;  %v374_v30 = vmul.f32 0.70710677, %v342_v24  ;;  %v335_v35 = vadd.f32 %v530_v16, %v216_v33  ;;  %v795_v36 = vadd.f32 %v530_v16, %v248_v34 }
  0xfa   :  { %690 = verf.f32 %v368_v27  ;;  %v369_v37 = vmul.f32 0.70710677, %v337_v31  ;;  %v377_v38 = vmul.f32 0.70710677, %v793_v32  ;;  %v352_v1 = vmul.f32 0.5, %v336_v19 }
  0xfb   :  { %692 = verf.f32 %v376_v28  ;;  %v367_v39 = vmul.f32 0.70710677, %v335_v35  ;;  %v375_v41 = vmul.f32 0.70710677, %v795_v36  ;;  %v360_v2 = vmul.f32 0.5, %v344_v20 }
  0xfc   :  { %694 = verf.f32 %v366_v29  ;;  %v350_v6 = vmul.f32 0.5, %v334_v23  ;;  %v358_v10 = vmul.f32 0.5, %v342_v24  ;;  %v353_v11 = vmul.f32 0.5, %v337_v31 }
  0xfd   :  { %696 = verf.f32 %v374_v30  ;;  %v648_v40 = vpop.f32.mrb[4].mxu0  ;;  %v656_v43 = vpop.f32.mrb[4].mxu1  ;;  %v361_v18 = vmul.f32 0.5, %v793_v32  ;;  %v351_v20 = vmul.f32 0.5, %v335_v35  ;;  %v359_v27 = vmul.f32 0.5, %v795_v36 }
  0xfe   :  { %698 = verf.f32 %v369_v37  ;;  %v799_v42 = vadd.f32 %v648_v40, %v530_v16  ;;  %v229_v44 = vpop.f32.mrb[5].mxu0  ;;  %v801_v45 = vadd.f32 %v656_v43, %v530_v16  ;;  %v261_v47 = vpop.f32.mrb[5].mxu1 }
  0xff   :  { %700 = verf.f32 %v377_v38  ;;  %v803_v46 = vadd.f32 %v530_v16, %v229_v44  ;;  %v649_v48 = vpop.f32.mrb[6].mxu0  ;;  %v806_v50 = vadd.f32 %v530_v16, %v261_v47  ;;  %v657_v51 = vpop.f32.mrb[6].mxu1 }
 0x100   :  { %702 = verf.f32 %v367_v39  ;;  %v372_v49 = vmul.f32 0.70710677, %v799_v42  ;;  %v232_v52 = vpop.f32.mrb[7].mxu0  ;;  %v380_v53 = vmul.f32 0.70710677, %v801_v45  ;;  %v264_v54 = vpop.f32.mrb[7].mxu1  ;;  %v811_v57 = vadd.f32 %v649_v48, %v530_v16 }
 0x101   :  { %704 = verf.f32 %v375_v41  ;;  %v370_v55 = vmul.f32 0.70710677, %v803_v46  ;;  %v378_v56 = vmul.f32 0.70710677, %v806_v50  ;;  %v813_v58 = vadd.f32 %v657_v51, %v530_v16 }
 0x102   :  { %706 = verf.f32 %v372_v49  ;;  %v815_v59 = vadd.f32 %v530_v16, %v232_v52  ;;  %v373_v62 = vmul.f32 0.70710677, %v811_v57  ;;  %v818_v63 = vadd.f32 %v530_v16, %v264_v54 }
 0x103   :  { %708 = verf.f32 %v380_v53  ;;  %v381_v3 = vmul.f32 0.70710677, %v813_v58  ;;  %v356_v44 = vmul.f32 0.5, %v799_v42  ;;  %v364_v49 = vmul.f32 0.5, %v801_v45 }
 0x104   :  { %v691_v60 = vpop.eup %690  ;;  %710 = verf.f32 %v370_v55  ;;  %v371_v7 = vmul.f32 0.70710677, %v815_v59  ;;  %v379_v15 = vmul.f32 0.70710677, %v818_v63  ;;  %v357_v52 = vmul.f32 0.5, %v811_v57 }
 0x105   :  { %v693_v61 = vpop.eup %692  ;;  %712 = verf.f32 %v378_v56  ;;  %v400_v5 = vadd.f32 1.0, %v691_v60  ;;  %v354_v55 = vmul.f32 0.5, %v803_v46  ;;  %v365_v56 = vmul.f32 0.5, %v813_v58 }
 0x106   :  { %v695_v0 = vpop.eup %694  ;;  %714 = verf.f32 %v373_v62  ;;  %v408_v9 = vadd.f32 1.0, %v693_v61  ;;  %v355_v42 = vmul.f32 0.5, %v815_v59  ;;  %v362_v45 = vmul.f32 0.5, %v806_v50 }
 0x107   :  { %v697_v4 = vpop.eup %696  ;;  %716 = verf.f32 %v381_v3  ;;  %v398_v13 = vadd.f32 1.0, %v695_v0  ;;  %v416_v22 = vmul.f32 %v400_v5, %v352_v1  ;;  %v363_v57 = vmul.f32 0.5, %v818_v63 }
 0x108   :  { %v699_v8 = vpop.eup %698  ;;  %718 = verf.f32 %v371_v7  ;;  %v406_v17 = vadd.f32 1.0, %v697_v4  ;;  %v424_v24 = vmul.f32 %v408_v9, %v360_v2 }
 0x109   :  { %v701_v12 = vpop.eup %700  ;;  %v401_v14 = vadd.f32 1.0, %v699_v8  ;;  %720 = verf.f32 %v379_v15  ;;  %v414_v30 = vmul.f32 %v398_v13, %v350_v6 }
 0x10a   :  { %v703_v16 = vpop.eup %702  ;;  %v409_v19 = vadd.f32 1.0, %v701_v12  ;;  %v422_v37 = vmul.f32 %v406_v17, %v358_v10 }
 0x10b   :  { %v705_v21 = vpop.eup %704  ;;  %v417_v23 = vmul.f32 %v401_v14, %v353_v11  ;;  %v399_v25 = vadd.f32 1.0, %v703_v16 }
 0x10c   :  { %v425_v26 = vmul.f32 %v409_v19, %v361_v18  ;;  %v407_v28 = vadd.f32 1.0, %v705_v21  ;;  %v707_v29 = vpop.eup %706 }
 0x10d   :  { %v571_v31 = vpack.c.bf16 %v417_v23, %v416_v22  ;;  %v415_v33 = vmul.f32 %v399_v25, %v351_v20  ;;  %v709_v34 = vpop.eup %708  ;;  %v404_v41 = vadd.f32 1.0, %v707_v29 }
 0x10e   :  { %v591_v38 = vpack.c.bf16 %v425_v26, %v424_v24  ;;  %v423_v32 = vmul.f32 %v407_v28, %v359_v27  ;;  %v711_v39 = vpop.eup %710  ;;  %v412_v47 = vadd.f32 1.0, %v709_v34 }
 0x10f   :  { %603 = vst [vmem:[%s860_s3 + $0x8] sm:$0xff] %v571_v31   ;;  %v566_v35 = vpack.c.bf16 %v415_v33, %v414_v30  ;;  %v713_v40 = vpop.eup %712  ;;  %v402_v51 = vadd.f32 1.0, %v711_v39  ;;  %v420_v61 = vmul.f32 %v404_v41, %v356_v44 }
 0x110   :  { %607 = vst [vmem:[%s860_s3 + $0x28] sm:$0xff] %v591_v38   ;;  %v586_v36 = vpack.c.bf16 %v423_v32, %v422_v37  ;;  %v715_v43 = vpop.eup %714  ;;  %v410_v62 = vadd.f32 1.0, %v713_v40  ;;  %v428_v3 = vmul.f32 %v412_v47, %v364_v49 }
 0x111   :  { %567 = vst [vmem:[%s860_s3] sm:$0xff] %v566_v35   ;;  %v717_v48 = vpop.eup %716  ;;  %v405_v53 = vadd.f32 1.0, %v715_v43  ;;  %v418_v5 = vmul.f32 %v402_v51, %v354_v55 }
 0x112   :  { %606 = vst [vmem:[%s860_s3 + $0x20] sm:$0xff] %v586_v36   ;;  %v719_v54 = vpop.eup %718  ;;  %v413_v60 = vadd.f32 1.0, %v717_v48  ;;  %v426_v58 = vmul.f32 %v410_v62, %v362_v45 }
 0x113   :  { %v421_v0 = vmul.f32 %v405_v53, %v357_v52  ;;  %v403_v1 = vadd.f32 1.0, %v719_v54  ;;  %v721_v2 = vpop.eup %720 }
 0x114   :  { %v429_v4 = vmul.f32 %v413_v60, %v365_v56  ;;  %v411_v46 = vadd.f32 1.0, %v721_v2 }
 0x115   :  { %v581_v6 = vpack.c.bf16 %v421_v0, %v420_v61  ;;  %v419_v7 = vmul.f32 %v403_v1, %v355_v42 }
 0x116   :  { %v601_v8 = vpack.c.bf16 %v429_v4, %v428_v3  ;;  %v427_v9 = vmul.f32 %v411_v46, %v363_v57 }
 0x117   :  { %605 = vst [vmem:[%s860_s3 + $0x18] sm:$0xff] %v581_v6   ;;  %v576_v59 = vpack.c.bf16 %v419_v7, %v418_v5 }
 0x118   :  { %609 = vst [vmem:[%s860_s3 + $0x38] sm:$0xff] %v601_v8   ;;  %v596_v50 = vpack.c.bf16 %v427_v9, %v426_v58 }
 0x119   :  { %604 = vst [vmem:[%s860_s3 + $0x10] sm:$0xff] %v576_v59  }
 0x11a   :  { %608 = vst [vmem:[%s860_s3 + $0x30] sm:$0xff] %v596_v50  }

// kernel: _forward.3
= control target key start
LH: loop header
LB: loop body
LE: loop exit
PB: predicated region body
PF: predicated region fallthrough
CT: control target
= control target key end

     0   :  { %s487_s0 = inlined_call_operand.vmem [shape: bf16[32,256], index: 0, kind: input, shape index: {}]   ;;  %s488_s1 = inlined_call_operand.vmem [shape: bf16[256,128], index: 1, kind: input, shape index: {}]   ;;  %s489_s2 = inlined_call_operand.vmem [shape: f32[1,128], index: 2, kind: input, shape index: {}]   ;;  %s490_s3 = inlined_call_operand.hbm [shape: f32[32,128], index: 3, kind: output, shape index: {}]  }
   0x1   :  { %v343_v0 = vld [vmem:[%s488_s1 + $0x40] sm:$0xff]   ;;  %v345_v2 = vld [vmem:[%s488_s1 + $0x48] sm:$0xff]   ;;  %v347_v4 = vld [vmem:[%s488_s1 + $0x50] sm:$0xff]  }
   0x2   :  { %v344_v1 = vld [vmem:[%s488_s1] sm:$0xff]   ;;  %296 = vmatprep.subr.bf16.mxu0 %v343_v0  ;;  %324 = vmatprep.subr.bf16.mxu1 %v343_v0  ;;  %v346_v3 = vld [vmem:[%s488_s1 + $0x8] sm:$0xff]   ;;  %v348_v5 = vld [vmem:[%s488_s1 + $0x10] sm:$0xff]  }
   0x3   :  { %297 = vmatpush3.bf16.msra.mxu0 %v344_v1  ;;  %332 = vmatpush3.bf16.msra.mxu1 %v344_v1  ;;  %v349_v6 = vld [vmem:[%s488_s1 + $0x58] sm:$0xff]   ;;  %v351_v8 = vld [vmem:[%s488_s1 + $0x60] sm:$0xff]   ;;  %v353_v10 = vld [vmem:[%s488_s1 + $0x68] sm:$0xff]  }
   0x4   :  { %298 = vmatprep.subr.bf16.mxu0 %v345_v2  ;;  %325 = vmatprep.subr.bf16.mxu1 %v345_v2  ;;  %v350_v7 = vld [vmem:[%s488_s1 + $0x18] sm:$0xff]   ;;  %v352_v9 = vld [vmem:[%s488_s1 + $0x20] sm:$0xff]  }
   0x5   :  { %v361_v11 = vld [vmem:[%s487_s0 + $0x4] ss:$8 sps:$4 sm:$0xff]   ;;  %v364_v12 = vld [vmem:[%s487_s0 + $0x14] ss:$8 sps:$4 sm:$0xff]  }
   0x7   :  { %299 = vmatpush3.bf16.msra.mxu0 %v346_v3  ;;  %333 = vmatpush3.bf16.msra.mxu1 %v346_v3 }
   0x8   :  { %300 = vmatprep.subr.bf16.mxu0 %v347_v4  ;;  %326 = vmatprep.subr.bf16.mxu1 %v347_v4 }
   0xb   :  { %301 = vmatpush3.bf16.msra.mxu0 %v348_v5  ;;  %334 = vmatpush3.bf16.msra.mxu1 %v348_v5 }
   0xc   :  { %302 = vmatprep.subr.bf16.mxu0 %v349_v6  ;;  %327 = vmatprep.subr.bf16.mxu1 %v349_v6 }
   0xf   :  { %303 = vmatpush3.bf16.msra.mxu0 %v350_v7  ;;  %335 = vmatpush3.bf16.msra.mxu1 %v350_v7 }
  0x10   :  { %304 = vmatprep.subr.bf16.mxu0 %v351_v8  ;;  %328 = vmatprep.subr.bf16.mxu1 %v351_v8 }
  0x11   :  { %8 = vsyncpa [#allocation4], 0  ;;  %v354_v13 = vld [vmem:[%s488_s1 + $0x28] sm:$0xff]   ;;  %v355_v14 = vld [vmem:[%s488_s1 + $0x70] sm:$0xff]   ;;  %212 = vmatprep.mubr.bf16.mxu0 %v361_v11  ;;  %220 = vmatprep.mubr.bf16.mxu1 %v364_v12 }
  0x12   :  { %v356_v15 = vld [vmem:[%s488_s1 + $0x30] sm:$0xff]   ;;  %v357_v16 = vld [vmem:[%s488_s1 + $0x78] sm:$0xff]   ;;  %v359_v18 = vld [vmem:[%s487_s0] ss:$8 sps:$4 sm:$0xff]  }
  0x13   :  { %305 = vmatpush3.bf16.msra.mxu0 %v352_v9  ;;  %336 = vmatpush3.bf16.msra.mxu1 %v352_v9  ;;  %v358_v17 = vld [vmem:[%s488_s1 + $0x38] sm:$0xff]   ;;  %v295_v23 = vld [vmem:[%s489_s2] ss:$0 sm:$0xff]  ;;  %s389_s1 = smov [#allocation3]  }
  0x14   :  { %306 = vmatprep.subr.bf16.mxu0 %v353_v10  ;;  %329 = vmatprep.subr.bf16.mxu1 %v353_v10  ;;  %v362_v19 = vld [vmem:[%s487_s0 + $0x10] ss:$8 sps:$4 sm:$0xff]   ;;  %s264_s27 = sshll.u32 %s389_s1, 4  ;;  %s265_s27 = int_to_ptr.vmem [resolvable:$true] %s264_s27 }
  0x15   :  { %s365_s0 = scalar_lea.vmem %s265_s27, 512  ;;  %p370_p1 = scmp.lt.s32.totalorder %s265_s27, %s265_s27 }
  0x16   :  { %p366_p0 = scmp.ne.s32.totalorder %s265_s27, %s365_s0  ;;  %p371_p2 = scmp.lt.s32.totalorder %s365_s0, %s365_s0 }
  0x17   :  { %307 = vmatpush3.bf16.msra.mxu0 %v354_v13  ;;  %337 = vmatpush3.bf16.msra.mxu1 %v354_v13 }
  0x18   :  { %308 = vmatprep.subr.bf16.mxu0 %v355_v14  ;;  %330 = vmatprep.subr.bf16.mxu1 %v355_v14  ;;  %p372_p3 = por %p371_p2, %p370_p1 }
  0x1a   :  { %p373_p4 = pnand %p372_p3, %p366_p0 }
  0x1b   :  { %309 = vmatpush3.bf16.msra.mxu0 %v356_v15  ;;  %338 = vmatpush3.bf16.msra.mxu1 %v356_v15 }
  0x1c   :  { %310 = vmatprep.subr.bf16.mxu0 %v357_v16  ;;  %331 = vmatprep.subr.bf16.mxu1 %v357_v16 }
  0x1f   :  { %311 = vmatpush3.bf16.msra.mxu0 %v358_v17  ;;  %339 = vmatpush3.bf16.msra.mxu1 %v358_v17 }
  0x22   :  { %213 = vmatmul.mubr.bf16.vlgmr.msra.gmra.mrb[0].mxu0 %v359_v18  ;;  %221 = vmatmul.mubr.bf16.vlgmr.msra.gmra.mrb[0].mxu1 %v362_v19 }
  0xf5   :  { %v312_v20 = vpop.f32.mrb[0].mxu0  ;;  %v318_v21 = vpop.f32.mrb[0].mxu1 }
  0xf6   :  { %v313_v22 = vpop.f32.mrb[1].mxu0  ;;  %v319_v24 = vpop.f32.mrb[1].mxu1 }
  0xf7   :  { %v314_v25 = vadd.f32 %v313_v22, %v312_v20  ;;  %v320_v26 = vadd.f32 %v319_v24, %v318_v21  ;;  %v315_v27 = vpop.f32.mrb[2].mxu0  ;;  %v321_v28 = vpop.f32.mrb[2].mxu1 }
  0xf8   :  { %v316_v29 = vpop.f32.mrb[3].mxu0  ;;  %v322_v30 = vpop.f32.mrb[3].mxu1 }
  0xf9   :  { %v251_v31 = vadd.f32 %v314_v25, %v295_v23  ;;  %v253_v32 = vadd.f32 %v320_v26, %v295_v23  ;;  %v317_v33 = vadd.f32 %v316_v29, %v315_v27  ;;  %v323_v34 = vadd.f32 %v322_v30, %v321_v28 }
  0xfb   :  { %255 = vst [vmem:[#allocation3] sm:$0xff] %v251_v31  ;;  %257 = vst [vmem:[#allocation3 + $0x10] sm:$0xff] %v253_v32  ;;  %v252_v35 = vadd.f32 %v317_v33, %v295_v23  ;;  %v254_v36 = vadd.f32 %v323_v34, %v295_v23 }
  0xfd   :  { %256 = vst [vmem:[#allocation3 + $0x8] sm:$0xff] %v252_v35  ;;  %258 = vst [vmem:[#allocation3 + $0x18] sm:$0xff] %v254_v36 }
  0xfe   :  { %376 = shalt.err (!%p373_p4)
}
  0xff   :  { %s377_s29 = scalar_lea.hbm %s490_s3, 512 }
 0x100   :  { %p378_p5 = scmp.ne.s32.totalorder %s490_s3, %s377_s29  ;;  %p381_p6 = scmp.lt.u32.totalorder %s377_s29, %s490_s3 }
 0x102   :  { %p383_p7 = pnand %p381_p6, %p378_p5 }
 0x104   :  { %386 = shalt.err (!%p383_p7)
}
 0x105   :  { %s390_s7 = smov 128   ;;  %s391_s8 = smov 8  }
 0x106   :  { %270 = dma.vmem_to_hbm [thread:$0]  %s265_s27, 512, %s490_s3, [#allocation4], %s390_s7, %s390_s7, %s391_s8  }
 0x107   :  { %387 = dma.done.wait [#allocation4], 512  }
 0x108   :  { %388 = vsyncadd [#allocation4], 4294966784 }
 0x109   :  { %274 = vsyncpa [#allocation4], 1 }

</bundles_post_ra>
